<compile_context>
chip_gen: v7x
topology: tpu7x:2x2x1
jax: 0.10.0
libtpu: 0.0.40
codegen_flags: <defaults>
</compile_context>

<pallas_src>
import jax
import jax.numpy as jnp
from jax.experimental import pallas as pl
from jax.experimental.pallas import tpu as pltpu


def ffn_kernel(x_ref, w1_ref, b1_ref, w2_ref, b2_ref, o_ref):
    # x_ref:  (tm, E_pad)   bf16
    # w1_ref: (E_pad, th)   bf16      b1_ref: (1, th)    f32
    # w2_ref: (th, E_pad)   bf16      b2_ref: (1, E_pad) f32
    # o_ref:  (tm, E_pad)   f32  -- resident across the hidden axis, used as the
    #                              f32 accumulator directly (no scratch).
    j = pl.program_id(1)

    @pl.when(j == 0)
    def _():
        # Initialize the resident output block with the final bias.
        o_ref[...] = jnp.broadcast_to(b2_ref[...], o_ref.shape).astype(o_ref.dtype)

    # First matmul on this hidden slab: (tm, E) @ (E, th) -> (tm, th), f32 acc.
    h = jnp.dot(x_ref[...], w1_ref[...], preferred_element_type=jnp.float32)
    h = jnp.maximum(h + b1_ref[...], 0.0)      # bias + ReLU in f32 (v5e-safe)
    # Dropout #1: identity (eval mode)

    # Second matmul, accumulate over hidden slabs into the resident output:
    # (tm, th) @ (th, E) -> (tm, E)
    o_ref[...] += jnp.dot(h.astype(w2_ref.dtype), w2_ref[...],
                          preferred_element_type=jnp.float32)
    # Dropout #2: identity (eval mode)


def _round_up(n, m):
    return ((n + m - 1) // m) * m


def _pad2(a, rows, cols):
    pr, pc = rows - a.shape[0], cols - a.shape[1]
    if pr or pc:
        a = jnp.pad(a, ((0, pr), (0, pc)))
    return a


def feed_forward(x, w1, b1, w2, b2, *, vmem_budget_bytes=40 * 1024 * 1024):
    """x: (B, T, E) f32; w1: (E, 4E); b1: (1, 4E); w2: (4E, E); b2: (1, E)."""
    B, T, E = x.shape
    H = w1.shape[1]
    N = B * T

    # Lane-dense E, tile-aligned N and H.
    E_pad = _round_up(max(E, 128), 128)
    H_full = _round_up(max(H, 128), 128)

    # Row tile: big enough to be MXU-bound on the weight stream for large N,
    # adaptive for small-N / decode so we don't pad 16 tokens to 512 rows.
    tm = min(512, _round_up(max(N, 8), 8))
    N_pad = _round_up(N, tm)
    n_row_tiles = N_pad // tm

    out_bytes = 4  # f32 output

    def step_bytes(th):
        # Per-step VMEM working set, assuming everything is double-buffered.
        w_bufs = 2 * (E_pad * th * 2 + th * E_pad * 2 + th * 4)
        x_bufs = 2 * tm * E_pad * 2
        o_bufs = 2 * tm * E_pad * out_bytes
        b2_buf = 2 * E_pad * 4
        return w_bufs + x_bufs + o_bufs + b2_buf

    # Prefer keeping the full hidden dim in one slab (weight block index is then
    # constant over the whole grid -> W1/W2 DMA'd from HBM exactly once).
    # Otherwise pick the largest multiple-of-128 slab that fits the budget.
    th = 128
    for cand in (H_full, 4096, 2048, 1024, 768, 512, 256, 128):
        if cand <= H_full and cand % 128 == 0 and step_bytes(cand) <= vmem_budget_bytes:
            th = cand
            break
    H_pad = _round_up(H_full, th)
    n_h_tiles = H_pad // th

    vmem_limit_bytes = min(max(step_bytes(th) + (8 << 20), 32 << 20), 100 << 20)

    # Pad + cast only when needed (zero padding contributes nothing: padded
    # W/b entries are zero and ReLU(0) = 0; padded rows/cols are sliced off).
    x2 = x.reshape(N, E)
    x2 = _pad2(x2, N_pad, E_pad)
    if x2.dtype != jnp.bfloat16:
        x2 = x2.astype(jnp.bfloat16)
    w1p = _pad2(w1, E_pad, H_pad).astype(jnp.bfloat16)
    b1p = _pad2(b1.reshape(1, -1), 1, H_pad).astype(jnp.float32)
    w2p = _pad2(w2, H_pad, E_pad).astype(jnp.bfloat16)
    b2p = _pad2(b2.reshape(1, -1), 1, E_pad).astype(jnp.float32)

    # Weights are re-fetched per row tile only when the hidden axis is tiled.
    weight_fetches = n_row_tiles if n_h_tiles > 1 else 1
    cost = pl.CostEstimate(
        flops=2 * 2 * N_pad * E_pad * H_pad,
        transcendentals=0,
        bytes_accessed=(x2.size * 2 + N_pad * E_pad * out_bytes
                        + weight_fetches * (w1p.size * 2 + w2p.size * 2
                                            + b1p.size * 4 + b2p.size * 4)),
    )

    out = pl.pallas_call(
        ffn_kernel,
        out_shape=jax.ShapeDtypeStruct((N_pad, E_pad), jnp.float32),
        grid_spec=pltpu.PrefetchScalarGridSpec(
            num_scalar_prefetch=0,
            grid=(n_row_tiles, n_h_tiles),
            in_specs=[
                pl.BlockSpec((tm, E_pad), lambda i, j: (i, 0)),   # x rows
                pl.BlockSpec((E_pad, th), lambda i, j: (0, j)),   # W1 hidden slab
                pl.BlockSpec((1, th),     lambda i, j: (0, j)),   # b1 slab
                pl.BlockSpec((th, E_pad), lambda i, j: (j, 0)),   # W2 hidden slab
                pl.BlockSpec((1, E_pad),  lambda i, j: (0, 0)),   # b2 (invariant)
            ],
            out_specs=pl.BlockSpec((tm, E_pad), lambda i, j: (i, 0)),
        ),
        compiler_params=pltpu.CompilerParams(
            dimension_semantics=("parallel", "arbitrary"),
            vmem_limit_bytes=vmem_limit_bytes,
        ),
        cost_estimate=cost,
    )(x2, w1p, b1p, w2p, b2p)

    if N_pad != N or E_pad != E:
        out = out[:N, :E]
    return out.reshape(B, T, E)


def init_params(key, num_embed):
    """Deterministic init matching torch.nn.Linear defaults (uniform +-1/sqrt(fan_in))."""
    hidden = 4 * num_embed
    k1, k2, k3, k4 = jax.random.split(key, 4)
    bound1 = 1.0 / (num_embed ** 0.5)
    bound2 = 1.0 / (hidden ** 0.5)
    # stored as (in_features, out_features) == torch weight.T
    w1 = jax.random.uniform(k1, (num_embed, hidden), jnp.float32, -bound1, bound1)
    b1 = jax.random.uniform(k2, (1, hidden), jnp.float32, -bound1, bound1)
    w2 = jax.random.uniform(k3, (hidden, num_embed), jnp.float32, -bound2, bound2)
    b2 = jax.random.uniform(k4, (1, num_embed), jnp.float32, -bound2, bound2)
    return w1, b1, w2, b2


if __name__ == "__main__":
    B, T, E = 2, 8, 32          # batch=2, seq=8, num_embed=32 (hidden = 128)
    key = jax.random.PRNGKey(0)
    kx, kp = jax.random.split(key)
    x = jax.random.normal(kx, (B, T, E), jnp.float32)
    w1, b1, w2, b2 = init_params(kp, E)

    out = feed_forward(x, w1, b1, w2, b2)
    out = jax.block_until_ready(out)

    # Reference in plain JAX using the same bf16-rounded operands as the kernel.
    xb = x.reshape(-1, E).astype(jnp.bfloat16).astype(jnp.float32)
    w1b = w1.astype(jnp.bfloat16).astype(jnp.float32)
    w2b = w2.astype(jnp.bfloat16).astype(jnp.float32)
    h_ref = jnp.maximum(xb @ w1b + b1, 0.0)
    h_ref = h_ref.astype(jnp.bfloat16).astype(jnp.float32)
    ref = (h_ref @ w2b + b2).reshape(B, T, E)

    assert out.shape == (B, T, E)
    assert jnp.allclose(out, ref, atol=1e-2, rtol=1e-2), "mismatch vs reference"

    print("KERNEL_OK")
</pallas_src>

<mosaic_0001>
module attributes {stable_mosaic.version = 11 : i64} {
  func.func @ffn_kernel(%arg0: i32, %arg1: i32, %arg2: memref<16x128xbf16, #tpu.memory_space<vmem>>, %arg3: memref<128x128xbf16, #tpu.memory_space<vmem>>, %arg4: memref<1x128xf32, #tpu.memory_space<vmem>>, %arg5: memref<128x128xbf16, #tpu.memory_space<vmem>>, %arg6: memref<1x128xf32, #tpu.memory_space<vmem>>, %arg7: memref<16x128xf32, #tpu.memory_space<vmem>>) attributes {dimension_semantics = [#tpu.dimension_semantics<parallel>, #tpu.dimension_semantics<arbitrary>], iteration_bounds = array<i64: 1, 1>, scalar_prefetch = 0 : i64, scratch_operands = 0 : i64, tpu.core_type = #tpu.core_type<tc>, window_params = [{transform_indices = @transform_0, window_bounds = array<i64: 16, 128>}, {transform_indices = @transform_1, window_bounds = array<i64: 128, 128>}, {transform_indices = @transform_2, window_bounds = array<i64: 1, 128>}, {transform_indices = @transform_3, window_bounds = array<i64: 128, 128>}, {pipeline_mode = #tpu.pipeline_mode<synchronous>, transform_indices = @transform_4, window_bounds = array<i64: 1, 128>}, {transform_indices = @transform_5, window_bounds = array<i64: 16, 128>}]} {
    %c0_i32 = arith.constant 0 : i32
    %0 = arith.cmpi eq, %arg1, %c0_i32 : i32
    %1 = arith.extui %0 : i1 to i32
    %c0_i32_0 = arith.constant 0 : i32
    %2 = arith.cmpi ne, %1, %c0_i32_0 : i32
    scf.if %2 {
      %c0_14 = arith.constant 0 : index
      %c0_15 = arith.constant 0 : index
      %17 = vector.load %arg6[%c0_14, %c0_15] : memref<1x128xf32, #tpu.memory_space<vmem>>, vector<1x128xf32>
      %18 = vector.shape_cast %17 : vector<1x128xf32> to vector<1x128xf32>
      %19 = vector.broadcast %18 : vector<1x128xf32> to vector<16x128xf32>
      %c0_16 = arith.constant 0 : index
      %c0_17 = arith.constant 0 : index
      %20 = vector.load %arg7[%c0_16, %c0_17] : memref<16x128xf32, #tpu.memory_space<vmem>>, vector<16x128xf32>
      tpu.vector_store %arg7[%c0_16, %c0_17], %19 {strides = array<i32>} : memref<16x128xf32, #tpu.memory_space<vmem>>, vector<16x128xf32>,
    } else {
    }
    %c0 = arith.constant 0 : index
    %c0_1 = arith.constant 0 : index
    %3 = vector.load %arg2[%c0, %c0_1] : memref<16x128xbf16, #tpu.memory_space<vmem>>, vector<16x128xbf16>
    %c0_2 = arith.constant 0 : index
    %c0_3 = arith.constant 0 : index
    %4 = vector.load %arg3[%c0_2, %c0_3] : memref<128x128xbf16, #tpu.memory_space<vmem>>, vector<128x128xbf16>
    %cst = arith.constant dense<0.000000e+00> : vector<16x128xf32>
    %5 = tpu.matmul %3, %4, %cst {dimension_numbers = #tpu.dot_dimension_numbers<[1], [0], [0], [1], [0, 0, 1, 1], [], []>} : vector<16x128xbf16>, vector<128x128xbf16>, vector<16x128xf32> -> vector<16x128xf32>
    %c0_4 = arith.constant 0 : index
    %c0_5 = arith.constant 0 : index
    %6 = vector.load %arg4[%c0_4, %c0_5] : memref<1x128xf32, #tpu.memory_space<vmem>>, vector<1x128xf32>
    %7 = vector.broadcast %6 : vector<1x128xf32> to vector<16x128xf32>
    %8 = arith.addf %5, %7 : vector<16x128xf32>
    %cst_6 = arith.constant 0.000000e+00 : f32
    %9 = vector.broadcast %cst_6 : f32 to vector<16x128xf32>
    %10 = arith.maximumf %8, %9 : vector<16x128xf32>
    %c0_7 = arith.constant 0 : index
    %c0_8 = arith.constant 0 : index
    %11 = vector.load %arg7[%c0_7, %c0_8] : memref<16x128xf32, #tpu.memory_space<vmem>>, vector<16x128xf32>
    %12 = arith.truncf %10 : vector<16x128xf32> to vector<16x128xbf16>
    %c0_9 = arith.constant 0 : index
    %c0_10 = arith.constant 0 : index
    %13 = vector.load %arg5[%c0_9, %c0_10] : memref<128x128xbf16, #tpu.memory_space<vmem>>, vector<128x128xbf16>
    %cst_11 = arith.constant dense<0.000000e+00> : vector<16x128xf32>
    %14 = tpu.matmul %12, %13, %cst_11 {dimension_numbers = #tpu.dot_dimension_numbers<[1], [0], [0], [1], [0, 0, 1, 1], [], []>} : vector<16x128xbf16>, vector<128x128xbf16>, vector<16x128xf32> -> vector<16x128xf32>
    %15 = arith.addf %11, %14 : vector<16x128xf32>
    %c0_12 = arith.constant 0 : index
    %c0_13 = arith.constant 0 : index
    %16 = vector.load %arg7[%c0_12, %c0_13] : memref<16x128xf32, #tpu.memory_space<vmem>>, vector<16x128xf32>
    tpu.vector_store %arg7[%c0_12, %c0_13], %15 {strides = array<i32>} : memref<16x128xf32, #tpu.memory_space<vmem>>, vector<16x128xf32>,
    return
  }
  func.func @transform_0(%arg0: i32, %arg1: i32) -> (i32, i32) {
    %c0_i32 = arith.constant 0 : i32
    %c0_i32_0 = arith.constant 0 : i32
    return %arg0, %c0_i32 : i32, i32
  }
  func.func @transform_1(%arg0: i32, %arg1: i32) -> (i32, i32) {
    %c0_i32 = arith.constant 0 : i32
    %c0_i32_0 = arith.constant 0 : i32
    return %c0_i32, %arg1 : i32, i32
  }
  func.func @transform_2(%arg0: i32, %arg1: i32) -> (i32, i32) {
    %c0_i32 = arith.constant 0 : i32
    %c0_i32_0 = arith.constant 0 : i32
    return %c0_i32, %arg1 : i32, i32
  }
  func.func @transform_3(%arg0: i32, %arg1: i32) -> (i32, i32) {
    %c0_i32 = arith.constant 0 : i32
    %c0_i32_0 = arith.constant 0 : i32
    return %arg1, %c0_i32 : i32, i32
  }
  func.func @transform_4(%arg0: i32, %arg1: i32) -> (i32, i32) {
    %c0_i32 = arith.constant 0 : i32
    %c0_i32_0 = arith.constant 0 : i32
    %c0_i32_1 = arith.constant 0 : i32
    return %c0_i32, %c0_i32_0 : i32, i32
  }
  func.func @transform_5(%arg0: i32, %arg1: i32) -> (i32, i32) {
    %c0_i32 = arith.constant 0 : i32
    %c0_i32_0 = arith.constant 0 : i32
    return %arg0, %c0_i32 : i32, i32
  }
}

</mosaic_0001>

<bundles_post_ra>
// kernel: tpu_custom_call.1
= control target key start
LH: loop header
LB: loop body
LE: loop exit
PB: predicated region body
PF: predicated region fallthrough
CT: control target
= control target key end

     0   :  { %10 = vsyncpa [#allocation3], 0  ;;  %s636_s0 = inlined_call_operand.hbm [shape: bf16[16,128], index: 0, kind: input, shape index: {}]   ;;  %s637_s1 = inlined_call_operand.hbm [shape: bf16[128,128], index: 1, kind: input, shape index: {}]   ;;  %s638_s2 = inlined_call_operand.vmem [shape: f32[1,128], index: 2, kind: input, shape index: {}]   ;;  %s639_s3 = inlined_call_operand.hbm [shape: bf16[128,128], index: 3, kind: input, shape index: {}]   ;;  %s640_s4 = inlined_call_operand.vmem [shape: f32[1,128], index: 4, kind: input, shape index: {}]   ;;  %s641_s5 = inlined_call_operand.hbm [shape: f32[16,128], index: 5, kind: output, shape index: {}]  }
   0x1   :  { %11 = vsyncpa [#allocation6], 0 }
   0x2   :  { %12 = vsyncpa [#allocation4], 0  ;;  %s526_s18 = smov [#allocation5]   ;;  %s527_s20 = smov [#allocation2]  }
   0x3   :  { %s30_s19 = sshll.u32 %s526_s18, 4  ;;  %s18_s21 = sshll.u32 %s527_s20, 4  ;;  %s31_s19 = int_to_ptr.vmem [resolvable:$true] %s30_s19  ;;  %s566_s21 = int_to_ptr.vmem [resolvable:$true] %s18_s21 }
   0x4   :  { %s432_s24 = scalar_lea.hbm %s637_s1, 1024 }
   0x5   :  { %p433_p0 = scmp.ne.s32.totalorder %s637_s1, %s432_s24  ;;  %p436_p1 = scmp.lt.u32.totalorder %s432_s24, %s637_s1 }
   0x7   :  { %p438_p2 = pnand %p436_p1, %p433_p0 }
   0x9   :  { %441 = shalt.err (!%p438_p2)
}
   0xa   :  { %s442_s29 = scalar_lea.vmem %s31_s19, 1024  ;;  %p447_p4 = scmp.lt.s32.totalorder %s31_s19, %s31_s19 }
   0xb   :  { %p443_p3 = scmp.ne.s32.totalorder %s31_s19, %s442_s29  ;;  %p448_p5 = scmp.lt.s32.totalorder %s442_s29, %s442_s29 }
   0xd   :  { %p449_p6 = por %p448_p5, %p447_p4 }
   0xf   :  { %p450_p7 = pnand %p449_p6, %p443_p3 }
  0x11   :  { %453 = shalt.err (!%p450_p7)
}
  0x12   :  { %s528_s30 = smov 64   ;;  %s529_s6 = smov 4  }
  0x13   :  { %36 = dma.hbm_to_vmem [thread:$0]  %s637_s1, 1024, %s31_s19, [#allocation6], %s528_s30, %s528_s30, %s529_s6  }
  0x14   :  { %s454_s11 = scalar_lea.hbm %s636_s0, 128 }
  0x15   :  { %p455_p8 = scmp.ne.s32.totalorder %s636_s0, %s454_s11  ;;  %p458_p9 = scmp.lt.u32.totalorder %s454_s11, %s636_s0 }
  0x17   :  { %p460_p10 = pnand %p458_p9, %p455_p8 }
  0x19   :  { %463 = shalt.err (!%p460_p10)
}
  0x1a   :  { %s464_s16 = scalar_lea.vmem %s566_s21, 128  ;;  %p469_p12 = scmp.lt.s32.totalorder %s566_s21, %s566_s21 }
  0x1b   :  { %p465_p11 = scmp.ne.s32.totalorder %s566_s21, %s464_s16  ;;  %p470_p13 = scmp.lt.s32.totalorder %s464_s16, %s464_s16 }
  0x1d   :  { %p471_p0 = por %p470_p13, %p469_p12 }
  0x1f   :  { %p472_p1 = pnand %p471_p0, %p465_p11 }
  0x21   :  { %475 = shalt.err (!%p472_p1)
}
  0x22   :  { %24 = dma.hbm_to_vmem [thread:$0]  %s636_s0, 128, %s566_s21, [#allocation3], %s528_s30, %s528_s30, %s529_s6  }
  0x23   :  { %s530_s18 = smov [#allocation7]   ;;  %s476_s23 = scalar_lea.hbm %s639_s3, 1024 }
  0x24   :  { %s44_s19 = sshll.u32 %s530_s18, 4  ;;  %p477_p2 = scmp.ne.s32.totalorder %s639_s3, %s476_s23  ;;  %s45_s19 = int_to_ptr.vmem [resolvable:$true] %s44_s19 }
  0x25   :  { %p480_p3 = scmp.lt.u32.totalorder %s476_s23, %s639_s3 }
  0x27   :  { %p482_p4 = pnand %p480_p3, %p477_p2 }
  0x29   :  { %485 = shalt.err (!%p482_p4)
}
  0x2a   :  { %s486_s28 = scalar_lea.vmem %s45_s19, 1024  ;;  %p491_p6 = scmp.lt.s32.totalorder %s45_s19, %s45_s19 }
  0x2b   :  { %p487_p5 = scmp.ne.s32.totalorder %s45_s19, %s486_s28  ;;  %p492_p7 = scmp.lt.s32.totalorder %s486_s28, %s486_s28 }
  0x2d   :  { %p493_p8 = por %p492_p7, %p491_p6 }
  0x2f   :  { %p494_p9 = pnand %p493_p8, %p487_p5 }
  0x31   :  { %497 = shalt.err (!%p494_p9)
}
  0x32   :  { %50 = dma.hbm_to_vmem [thread:$0]  %s639_s3, 1024, %s45_s19, [#allocation6], %s528_s30, %s528_s30, %s529_s6  }
  0x33   :  { %520 = dma.done.wait [#allocation3], 128  }
  0x34   :  { %521 = vsyncadd [#allocation3], 4294967168 }
  0x35   :  { %522 = dma.done.wait [#allocation6], 2048  }
  0x36   :  { %523 = vsyncadd [#allocation6], 4294965248  ;;  %v531_v0 = vmov 0.0   ;;  %vm532_vm0 = vmmov 0   ;;  %v415_v1 = vld [vmem:[#allocation5] sm:$0xff]   ;;  %v416_v2 = vld [vmem:[#allocation5 + $0x8] sm:$0xff]  }
  0x37   :  { %365 = vmatprep.subr.bf16.mxu0 %v531_v0  ;;  %381 = vmatprep.mubr.msk.bf16.mxu0 %vm532_vm0, %v531_v0  ;;  %v417_v3 = vld [vmem:[#allocation5 + $0x10] sm:$0xff]   ;;  %v424_v4 = vld [vmem:[#allocation7] sm:$0xff]   ;;  %v418_v5 = vld [vmem:[#allocation5 + $0x18] sm:$0xff]   ;;  %s533_s7 = smov [#allocation8]  }
  0x38   :  { %385 = vmatprep.subr.bf16.mxu1 %v531_v0  ;;  %401 = vmatprep.mubr.msk.bf16.mxu1 %vm532_vm0, %v531_v0  ;;  %v425_v6 = vld [vmem:[#allocation7 + $0x8] sm:$0xff]   ;;  %v419_v7 = vld [vmem:[#allocation5 + $0x20] sm:$0xff]   ;;  %v426_v8 = vld [vmem:[#allocation7 + $0x10] sm:$0xff]   ;;  %s315_s8 = sshll.u32 %s533_s7, 4  ;;  %s316_s8 = int_to_ptr.vmem [resolvable:$true] %s315_s8 }
  0x39   :  { %366 = vmatpush3.bf16.msra.mxu0 %v415_v1  ;;  %386 = vmatpush3.bf16.msra.mxu1 %v424_v4  ;;  %v420_v9 = vld [vmem:[#allocation5 + $0x28] sm:$0xff]   ;;  %v427_v10 = vld [vmem:[#allocation7 + $0x18] sm:$0xff]   ;;  %v421_v11 = vld [vmem:[#allocation5 + $0x30] sm:$0xff]   ;;  %p503_p11 = scmp.lt.s32.totalorder %s316_s8, %s316_s8 }
  0x3a   :  { %367 = vmatprep.subr.bf16.mxu0 %v531_v0  ;;  %387 = vmatprep.subr.bf16.mxu1 %v531_v0  ;;  %v428_v12 = vld [vmem:[#allocation7 + $0x20] sm:$0xff]   ;;  %v422_v13 = vld [vmem:[#allocation5 + $0x38] sm:$0xff]   ;;  %v429_v14 = vld [vmem:[#allocation7 + $0x28] sm:$0xff]  }
  0x3b   :  { %v423_v15 = vld [vmem:[#allocation2] sm:$0xff]   ;;  %v430_v16 = vld [vmem:[#allocation7 + $0x30] sm:$0xff]  }
  0x3c   :  { %v431_v17 = vld [vmem:[#allocation7 + $0x38] sm:$0xff]  }
  0x3d   :  { %368 = vmatpush3.bf16.msra.mxu0 %v416_v2  ;;  %388 = vmatpush3.bf16.msra.mxu1 %v425_v6  ;;  %v329_v18 = vld [vmem:[%s638_s2] ss:$0 sm:$0xff]  ;;  %s498_s2 = scalar_lea.vmem %s316_s8, 256 }
  0x3e   :  { %369 = vmatprep.subr.bf16.mxu0 %v531_v0  ;;  %389 = vmatprep.subr.bf16.mxu1 %v531_v0  ;;  %v328_v28 = vld [vmem:[%s640_s4] ss:$0 sm:$0xff]  ;;  %p499_p10 = scmp.ne.s32.totalorder %s316_s8, %s498_s2  ;;  %p504_p12 = scmp.lt.s32.totalorder %s498_s2, %s498_s2 }
  0x40   :  { %p505_p13 = por %p504_p12, %p503_p11 }
  0x41   :  { %370 = vmatpush3.bf16.msra.mxu0 %v417_v3  ;;  %390 = vmatpush3.bf16.msra.mxu1 %v426_v8 }
  0x42   :  { %371 = vmatprep.subr.bf16.mxu0 %v531_v0  ;;  %391 = vmatprep.subr.bf16.mxu1 %v531_v0  ;;  %p506_p0 = pnand %p505_p13, %p499_p10 }
  0x45   :  { %372 = vmatpush3.bf16.msra.mxu0 %v418_v5  ;;  %392 = vmatpush3.bf16.msra.mxu1 %v427_v10 }
  0x46   :  { %373 = vmatprep.subr.bf16.mxu0 %v531_v0  ;;  %393 = vmatprep.subr.bf16.mxu1 %v531_v0 }
  0x49   :  { %374 = vmatpush3.bf16.msra.mxu0 %v419_v7  ;;  %394 = vmatpush3.bf16.msra.mxu1 %v428_v12 }
  0x4a   :  { %375 = vmatprep.subr.bf16.mxu0 %v531_v0  ;;  %395 = vmatprep.subr.bf16.mxu1 %v531_v0 }
  0x4d   :  { %376 = vmatpush3.bf16.msra.mxu0 %v420_v9  ;;  %396 = vmatpush3.bf16.msra.mxu1 %v429_v14 }
  0x4e   :  { %377 = vmatprep.subr.bf16.mxu0 %v531_v0  ;;  %397 = vmatprep.subr.bf16.mxu1 %v531_v0 }
  0x51   :  { %378 = vmatpush3.bf16.msra.mxu0 %v421_v11  ;;  %398 = vmatpush3.bf16.msra.mxu1 %v430_v16 }
  0x52   :  { %379 = vmatprep.subr.bf16.mxu0 %v531_v0  ;;  %399 = vmatprep.subr.bf16.mxu1 %v531_v0 }
  0x55   :  { %380 = vmatpush3.bf16.msra.mxu0 %v422_v13  ;;  %400 = vmatpush3.bf16.msra.mxu1 %v431_v17 }
  0x58   :  { %382 = vmatmul.mubr.bf16.vlgmr.msra.gmra.mrb[0].mxu0 %v423_v15 }
 0x12b   :  { %v189_v19 = vpop.f32.mrb[0].mxu0 }
 0x12c   :  { %v190_v20 = vadd.f32 %v329_v18, %v189_v19  ;;  %v383_v21 = vpop.f32.mrb[1].mxu0 }
 0x12d   :  { %v192_v22 = vpop.f32.mrb[2].mxu0 }
 0x12e   :  { %v193_v23 = vadd.f32 %v329_v18, %v192_v22  ;;  %v384_v24 = vpop.f32.mrb[3].mxu0  ;;  %v196_v25 = vmax.f32 %v190_v20, 0.0 }
 0x130   :  { %v197_v26 = vmax.f32 %v193_v23, 0.0 }
 0x132   :  { %v200_v27 = vpack.c.bf16 %v197_v26, %v196_v25 }
 0x134   :  { %402 = vmatmul.mubr.bf16.vlgmr.msra.gmra.mrb[0].mxu1 %v200_v27 }
 0x207   :  { %v299_v29 = vpop.f32.mrb[0].mxu1 }
 0x208   :  { %v306_v30 = vadd.f32 %v328_v28, %v299_v29  ;;  %v403_v31 = vpop.f32.mrb[1].mxu1 }
 0x209   :  { %v302_v32 = vpop.f32.mrb[2].mxu1 }
 0x20a   :  { %308 = vst [vmem:[#allocation8] sm:$0xff] %v306_v30  ;;  %v307_v33 = vadd.f32 %v328_v28, %v302_v32  ;;  %v404_v34 = vpop.f32.mrb[3].mxu1 }
 0x20c   :  { %309 = vst [vmem:[#allocation8 + $0x8] sm:$0xff] %v307_v33 }
 0x20d   :  { %509 = shalt.err (!%p506_p0)
}
 0x20e   :  { %s510_s10 = scalar_lea.hbm %s641_s5, 256 }
 0x20f   :  { %p511_p1 = scmp.ne.s32.totalorder %s641_s5, %s510_s10  ;;  %p514_p2 = scmp.lt.u32.totalorder %s510_s10, %s641_s5 }
 0x211   :  { %p516_p3 = pnand %p514_p2, %p511_p1 }
 0x213   :  { %519 = shalt.err (!%p516_p3)
}
 0x214   :  { %s534_s15 = smov 128   ;;  %s535_s16 = smov 8  }
 0x215   :  { %321 = dma.vmem_to_hbm [thread:$0]  %s316_s8, 256, %s641_s5, [#allocation4], %s534_s15, %s534_s15, %s535_s16  }
 0x216   :  { %524 = dma.done.wait [#allocation4], 256  }
 0x217   :  { %525 = vsyncadd [#allocation4], 4294967040 }
 0x218   :  { %325 = vsyncpa [#allocation3], 1 }
 0x219   :  { %326 = vsyncpa [#allocation6], 1 }
 0x21a   :  { %327 = vsyncpa [#allocation4], 1 }

</bundles_post_ra>
